<compile_context>
chip_gen: v7x
topology: tpu7x:2x2x1
jax: 0.10.0
libtpu: 0.0.40
codegen_flags: <defaults>
</compile_context>

<pallas_src>
import functools

import jax
import jax.numpy as jnp
from jax.experimental import pallas as pl
from jax.experimental.pallas import tpu as pltpu

BN_EPS = 1e-5
LANE = 128
NEG_INF = -1e30        # finite "minus infinity" for padded class columns


def _round_up(a, b):
    return (a + b - 1) // b * b


def _physical_vmem_bytes():
    try:
        return int(pltpu.get_tpu_info().vmem_capacity_bytes)
    except Exception:
        return 64 * 1024 * 1024   # conservative (v7x) fallback


# --------------------------------------------------------------------------------------
# Kernels
# --------------------------------------------------------------------------------------
def _pass1_kernel(adj_ref, z1_ref, w2_ref, vec_ref, z2_ref, acc_ref, *, h1_pad, h2_pad):
    """acc += adj_tile @ z1_tile ;  at k==last:  z2 = ReLU(acc + sh1) @ W2' + b2'."""
    k = pl.program_id(1)

    @pl.when(k == 0)
    def _():
        acc_ref[...] = jnp.zeros_like(acc_ref)

    acc_ref[...] += jnp.dot(adj_ref[...], z1_ref[...],
                            preferred_element_type=jnp.float32)

    @pl.when(k == pl.num_programs(1) - 1)
    def _():
        sh1 = vec_ref[0:1, :h1_pad]            # BN1 shift (scale pre-folded into z1)
        b2p = vec_ref[1:2, :h2_pad]            # b2 * s2
        h = jnp.maximum(acc_ref[...] + sh1, 0.0)
        z2 = jnp.dot(h.astype(w2_ref.dtype), w2_ref[...],
                     preferred_element_type=jnp.float32) + b2p
        z2_ref[...] = z2.astype(z2_ref.dtype)


def _pass2_kernel(adj_ref, z2_ref, w3_ref, vec_ref, logp_ref, t_ref, acc_ref, *,
                  h2_pad, c_pad):
    """acc += adj_tile @ z2_tile ;  at k==last:  t = ReLU(acc + sh2),
    logp = log_softmax(t @ W3 + b3)."""
    k = pl.program_id(1)

    @pl.when(k == 0)
    def _():
        acc_ref[...] = jnp.zeros_like(acc_ref)

    acc_ref[...] += jnp.dot(adj_ref[...], z2_ref[...],
                            preferred_element_type=jnp.float32)

    @pl.when(k == pl.num_programs(1) - 1)
    def _():
        sh2 = vec_ref[0:1, :h2_pad]
        b3 = vec_ref[1:2, :c_pad]              # padded classes carry -1e30
        t = jnp.maximum(acc_ref[...] + sh2, 0.0)
        logits = jnp.dot(t.astype(w3_ref.dtype), w3_ref[...],
                         preferred_element_type=jnp.float32) + b3
        # stable log_softmax; padded classes never win the max and contribute exp == 0.
        m = jnp.max(logits, axis=1, keepdims=True)
        z = logits - m
        lse = jnp.log(jnp.sum(jnp.exp(z), axis=1, keepdims=True))
        logp_ref[...] = (z - lse).astype(logp_ref.dtype)
        t_ref[...] = t.astype(t_ref.dtype)


# --------------------------------------------------------------------------------------
# Wrapper
# --------------------------------------------------------------------------------------
def gnn_forward(x_in, adj, params, *, block_rows=256, block_k=512,
                compute_dtype=jnp.bfloat16):
    """params: PyTorch-convention fc{1,2,3} weights ([out, in]) / biases and
    bn{1,2} gamma/beta/mean/var.  Returns (log_probs [N, n_class], t [N, n_hidden_2])."""
    N = x_in.shape[0]
    h1_dim = params["w1"].shape[0]
    h2_dim = params["w2"].shape[0]
    n_class = params["w3"].shape[0]
    f32 = jnp.float32

    # ---- tiling / padding geometry --------------------------------------------------
    tm = min(_round_up(block_rows, LANE), _round_up(N, LANE))     # row tile
    tk = tm * max(1, block_k // tm)                               # k tile (multiple of tm)
    tk = min(tk, _round_up(N, tm))
    n_pad = _round_up(N, tk)
    n_row_tiles = n_pad // tm
    n_k_tiles = n_pad // tk

    h1_pad = _round_up(h1_dim, LANE)
    h2_pad = _round_up(h2_dim, LANE)
    c_pad = _round_up(n_class, LANE)
    vmax1 = max(h1_pad, h2_pad)
    vmax2 = max(h2_pad, c_pad)

    def pad2(a, r, c):
        out = jnp.zeros((r, c), f32)
        return out.at[:a.shape[0], :a.shape[1]].set(a.astype(f32))

    def pad_vec(v, n, fill=0.0):
        out = jnp.full((n,), fill, f32)
        return out.at[:v.shape[0]].set(v.astype(f32))

    # ---- fold eval-mode BatchNorm into per-feature scale/shift ------------------------
    s1 = params["bn1_gamma"] / jnp.sqrt(params["bn1_var"] + BN_EPS)
    sh1 = params["bn1_beta"] - params["bn1_mean"] * s1
    s2 = params["bn2_gamma"] / jnp.sqrt(params["bn2_var"] + BN_EPS)
    sh2 = params["bn2_beta"] - params["bn2_mean"] * s2

    # layer-1 reassociation: z1 = x @ (W1^T * s1) + b1*s1 (tiny matmul, plain XLA).
    z1 = (jnp.dot(x_in.astype(f32), params["w1"].T.astype(f32) * s1[None, :])
          + (params["b1"].astype(f32) * s1)[None, :])

    # matmul operands (lane padded, cast to the streaming compute dtype)
    adj_p = pad2(adj, n_pad, n_pad).astype(compute_dtype)         # zero pad rows AND cols
    z1_p = pad2(z1, n_pad, h1_pad).astype(compute_dtype)
    w2_p = pad2(params["w2"].T * s2[None, :], h1_pad, h2_pad).astype(compute_dtype)
    w3_p = pad2(params["w3"].T, h2_pad, c_pad).astype(compute_dtype)

    # stacked small per-feature vectors (single BlockSpec each pass), kept in f32
    vec1 = jnp.zeros((2, vmax1), f32)
    vec1 = vec1.at[0, :h1_pad].set(pad_vec(sh1, h1_pad))
    vec1 = vec1.at[1, :h2_pad].set(pad_vec(params["b2"] * s2, h2_pad))
    vec2 = jnp.zeros((2, vmax2), f32)
    vec2 = vec2.at[0, :h2_pad].set(pad_vec(sh2, h2_pad))
    vec2 = vec2.at[1, :c_pad].set(pad_vec(params["b3"], c_pad, NEG_INF))

    isz = jnp.dtype(compute_dtype).itemsize
    phys_vmem = _physical_vmem_bytes()

    def vmem_limit(need):
        return int(min(max(need + (4 << 20), 16 << 20), phys_vmem))

    # ------------------------------- pass 1 -------------------------------------------
    p1_need = (2 * (tm * tk + tk * h1_pad + h1_pad * h2_pad) * isz   # streamed (2x)
               + 2 * 2 * vmax1 * 4                                   # vec
               + 2 * tm * h2_pad * isz                               # z2 out tile
               + tm * h1_pad * 4)                                    # acc scratch
    z2_full = pl.pallas_call(
        functools.partial(_pass1_kernel, h1_pad=h1_pad, h2_pad=h2_pad),
        out_shape=jax.ShapeDtypeStruct((n_pad, h2_pad), compute_dtype),
        grid=(n_row_tiles, n_k_tiles),
        in_specs=[
            pl.BlockSpec((tm, tk), lambda i, k: (i, k)),          # adj strip (streamed)
            pl.BlockSpec((tk, h1_pad), lambda i, k: (k, 0)),      # z1 k-tile
            pl.BlockSpec((h1_pad, h2_pad), lambda i, k: (0, 0)),  # W2' = W2^T * s2
            pl.BlockSpec((2, vmax1), lambda i, k: (0, 0)),        # [sh1 ; b2*s2]
        ],
        out_specs=pl.BlockSpec((tm, h2_pad), lambda i, k: (i, 0)),
        scratch_shapes=[pltpu.VMEM((tm, h1_pad), jnp.float32)],
        compiler_params=pltpu.CompilerParams(
            dimension_semantics=("parallel", "arbitrary"),
            vmem_limit_bytes=vmem_limit(p1_need)),
        cost_estimate=pl.CostEstimate(
            flops=2 * n_pad * n_pad * h1_pad + 2 * n_pad * h1_pad * h2_pad
                  + 4 * n_pad * h1_pad,
            transcendentals=0,
            bytes_accessed=n_pad * n_pad * isz
                           + n_row_tiles * n_pad * h1_pad * isz
                           + h1_pad * h2_pad * isz
                           + n_pad * h2_pad * isz),
    )(adj_p, z1_p, w2_p, vec1)

    # ------------------------------- pass 2 -------------------------------------------
    p2_need = (2 * (tm * tk + tk * h2_pad + h2_pad * c_pad) * isz
               + 2 * 2 * vmax2 * 4
               + 2 * tm * (c_pad + h2_pad) * 4
               + tm * h2_pad * 4)
    logp_full, t_full = pl.pallas_call(
        functools.partial(_pass2_kernel, h2_pad=h2_pad, c_pad=c_pad),
        out_shape=(jax.ShapeDtypeStruct((n_pad, c_pad), jnp.float32),
                   jax.ShapeDtypeStruct((n_pad, h2_pad), jnp.float32)),
        grid=(n_row_tiles, n_k_tiles),
        in_specs=[
            pl.BlockSpec((tm, tk), lambda i, k: (i, k)),          # adj strip (streamed)
            pl.BlockSpec((tk, h2_pad), lambda i, k: (k, 0)),      # z2 k-tile
            pl.BlockSpec((h2_pad, c_pad), lambda i, k: (0, 0)),   # W3^T
            pl.BlockSpec((2, vmax2), lambda i, k: (0, 0)),        # [sh2 ; b3(-inf pad)]
        ],
        out_specs=(pl.BlockSpec((tm, c_pad), lambda i, k: (i, 0)),
                   pl.BlockSpec((tm, h2_pad), lambda i, k: (i, 0))),
        scratch_shapes=[pltpu.VMEM((tm, h2_pad), jnp.float32)],
        compiler_params=pltpu.CompilerParams(
            dimension_semantics=("parallel", "arbitrary"),
            vmem_limit_bytes=vmem_limit(p2_need)),
        cost_estimate=pl.CostEstimate(
            flops=2 * n_pad * n_pad * h2_pad + 2 * n_pad * h2_pad * c_pad
                  + 8 * n_pad * c_pad,
            transcendentals=n_pad * c_pad + n_pad,
            bytes_accessed=n_pad * n_pad * isz
                           + n_row_tiles * n_pad * h2_pad * isz
                           + h2_pad * c_pad * isz
                           + n_pad * (c_pad + h2_pad) * 4),
    )(adj_p, z2_full, w3_p, vec2)

    return logp_full[:N, :n_class], t_full[:N, :h2_dim]


# --------------------------------------------------------------------------------------
# Pure-JAX references for validation
# --------------------------------------------------------------------------------------
def gnn_reference(x_in, adj, params):
    """Exact-f32, spec-order reference."""
    mm = functools.partial(jnp.dot, precision=jax.lax.Precision.HIGHEST)

    def bn(x, g, b, m, v):
        return (x - m) / jnp.sqrt(v + BN_EPS) * g + b

    h = mm(x_in, params["w1"].T) + params["b1"]
    h = jax.nn.relu(bn(mm(adj, h), params["bn1_gamma"], params["bn1_beta"],
                       params["bn1_mean"], params["bn1_var"]))
    h = mm(h, params["w2"].T) + params["b2"]
    t = jax.nn.relu(bn(mm(adj, h), params["bn2_gamma"], params["bn2_beta"],
                       params["bn2_mean"], params["bn2_var"]))
    logits = mm(t, params["w3"].T) + params["b3"]
    return jax.nn.log_softmax(logits, axis=1), t


def gnn_reference_lowp(x_in, adj, params, compute_dtype=jnp.bfloat16):
    """Pure-JAX emulation of the kernel's operand dtypes / BN folding (tight check)."""
    f32 = jnp.float32
    cd = compute_dtype
    s1 = params["bn1_gamma"] / jnp.sqrt(params["bn1_var"] + BN_EPS)
    sh1 = params["bn1_beta"] - params["bn1_mean"] * s1
    s2 = params["bn2_gamma"] / jnp.sqrt(params["bn2_var"] + BN_EPS)
    sh2 = params["bn2_beta"] - params["bn2_mean"] * s2
    z1 = (jnp.dot(x_in.astype(f32), params["w1"].T.astype(f32) * s1[None, :])
          + (params["b1"] * s1)[None, :]).astype(cd)
    adj_c = adj.astype(cd)
    h1 = jnp.maximum(jnp.dot(adj_c, z1, preferred_element_type=f32) + sh1[None, :], 0.0)
    w2p = (params["w2"].T * s2[None, :]).astype(cd)
    z2 = (jnp.dot(h1.astype(cd), w2p, preferred_element_type=f32)
          + (params["b2"] * s2)[None, :]).astype(cd)
    t = jnp.maximum(jnp.dot(adj_c, z2, preferred_element_type=f32) + sh2[None, :], 0.0)
    logits = jnp.dot(t.astype(cd), params["w3"].T.astype(cd),
                     preferred_element_type=f32) + params["b3"][None, :]
    return jax.nn.log_softmax(logits, axis=1), t


if __name__ == "__main__":
    n_feat, n_hidden_1, n_hidden_2, n_class = 16, 32, 32, 8

    def make_inputs(n, key):
        ks = jax.random.split(key, 8)
        x_in = jax.random.normal(ks[0], (n, n_feat), dtype=jnp.float32)
        # symmetric-ish row-normalized adjacency with self-loops
        a = (jax.random.uniform(ks[1], (n, n)) > 0.5).astype(jnp.float32)
        a = jnp.minimum(a + a.T + jnp.eye(n, dtype=jnp.float32), 1.0)
        adj = a / jnp.sum(a, axis=1, keepdims=True)
        params = {
            "w1": 0.1 * jax.random.normal(ks[2], (n_hidden_1, n_feat), jnp.float32),
            "b1": 0.1 * jax.random.normal(ks[3], (n_hidden_1,), jnp.float32),
            "bn1_gamma": jnp.ones((n_hidden_1,), jnp.float32),
            "bn1_beta": jnp.zeros((n_hidden_1,), jnp.float32),
            "bn1_mean": jnp.zeros((n_hidden_1,), jnp.float32),
            "bn1_var": jnp.ones((n_hidden_1,), jnp.float32),
            "w2": 0.1 * jax.random.normal(ks[4], (n_hidden_2, n_hidden_1), jnp.float32),
            "b2": 0.1 * jax.random.normal(ks[5], (n_hidden_2,), jnp.float32),
            "bn2_gamma": jnp.ones((n_hidden_2,), jnp.float32),
            "bn2_beta": jnp.zeros((n_hidden_2,), jnp.float32),
            "bn2_mean": jnp.zeros((n_hidden_2,), jnp.float32),
            "bn2_var": jnp.ones((n_hidden_2,), jnp.float32),
            "w3": 0.1 * jax.random.normal(ks[6], (n_class, n_hidden_2), jnp.float32),
            "b3": 0.1 * jax.random.normal(ks[7], (n_class,), jnp.float32),
        }
        return x_in, adj, params

    key = jax.random.PRNGKey(0)
    k1, k2, k3 = jax.random.split(key, 3)

    # Case 1: N = 256, default bf16 streamed operands (single row / k tile).
    x_in, adj, params = make_inputs(256, k1)
    logp, t = gnn_forward(x_in, adj, params)
    jax.block_until_ready((logp, t))
    logp_f32, t_f32 = gnn_reference(x_in, adj, params)
    logp_lp, t_lp = gnn_reference_lowp(x_in, adj, params)
    assert logp.shape == logp_f32.shape and t.shape == t_f32.shape
    assert jnp.allclose(logp, logp_lp, atol=2e-2, rtol=2e-2)      # tight vs bf16 emulation
    assert jnp.allclose(t, t_lp, atol=2e-2, rtol=2e-2)
    assert jnp.allclose(logp, logp_f32, atol=1e-1, rtol=1e-1)     # loose vs exact f32
    assert jnp.allclose(t, t_f32, atol=1e-1, rtol=1e-1)
    assert jnp.allclose(jnp.sum(jnp.exp(logp), axis=1), 1.0, atol=1e-5)

    # Case 2: N = 300 with small tiles -> 4 row tiles x 2 k tiles, padded rows/cols,
    # exercises the accumulator init/finalize path.
    x_in, adj, params = make_inputs(300, k2)
    logp, t = gnn_forward(x_in, adj, params, block_rows=128, block_k=256)
    jax.block_until_ready((logp, t))
    logp_f32, t_f32 = gnn_reference(x_in, adj, params)
    logp_lp, t_lp = gnn_reference_lowp(x_in, adj, params)
    assert jnp.allclose(logp, logp_lp, atol=2e-2, rtol=2e-2)
    assert jnp.allclose(t, t_lp, atol=2e-2, rtol=2e-2)
    assert jnp.allclose(logp, logp_f32, atol=1e-1, rtol=1e-1)
    assert jnp.allclose(t, t_f32, atol=1e-1, rtol=1e-1)
    assert jnp.allclose(jnp.sum(jnp.exp(logp), axis=1), 1.0, atol=1e-5)

    # Case 3: f32 operand path (default MXU precision, no HIGHEST), N = 200.
    x_in, adj, params = make_inputs(200, k3)
    logp, t = gnn_forward(x_in, adj, params, compute_dtype=jnp.float32)
    jax.block_until_ready((logp, t))
    logp_f32, t_f32 = gnn_reference(x_in, adj, params)
    assert jnp.allclose(logp, logp_f32, atol=5e-2, rtol=5e-2)
    assert jnp.allclose(t, t_f32, atol=5e-2, rtol=5e-2)
    assert jnp.allclose(jnp.sum(jnp.exp(logp), axis=1), 1.0, atol=1e-5)

    print("KERNEL_OK")
</pallas_src>

<mosaic_0001>
module attributes {stable_mosaic.version = 11 : i64} {
  func.func @_pass1_kernel(%arg0: i32, %arg1: i32, %arg2: memref<256x256xbf16, #tpu.memory_space<vmem>>, %arg3: memref<256x128xbf16, #tpu.memory_space<vmem>>, %arg4: memref<128x128xbf16, #tpu.memory_space<vmem>>, %arg5: memref<2x128xf32, #tpu.memory_space<vmem>>, %arg6: memref<256x128xbf16, #tpu.memory_space<vmem>>, %arg7: memref<256x128xf32, #tpu.memory_space<vmem>>) attributes {dimension_semantics = [#tpu.dimension_semantics<parallel>, #tpu.dimension_semantics<arbitrary>], iteration_bounds = array<i64: 1, 1>, scalar_prefetch = 0 : i64, scratch_operands = 1 : i64, tpu.core_type = #tpu.core_type<tc>, window_params = [{transform_indices = @transform_0, window_bounds = array<i64: 256, 256>}, {transform_indices = @transform_1, window_bounds = array<i64: 256, 128>}, {pipeline_mode = #tpu.pipeline_mode<synchronous>, transform_indices = @transform_2, window_bounds = array<i64: 128, 128>}, {pipeline_mode = #tpu.pipeline_mode<synchronous>, transform_indices = @transform_3, window_bounds = array<i64: 2, 128>}, {transform_indices = @transform_4, window_bounds = array<i64: 256, 128>}]} {
    %c0_i32 = arith.constant 0 : i32
    %0 = arith.cmpi eq, %arg1, %c0_i32 : i32
    %1 = arith.extui %0 : i1 to i32
    %c0_i32_0 = arith.constant 0 : i32
    %2 = arith.cmpi ne, %1, %c0_i32_0 : i32
    scf.if %2 {
      %cst_10 = arith.constant 0.000000e+00 : f32
      %12 = vector.broadcast %cst_10 : f32 to vector<256x128xf32>
      %c0_11 = arith.constant 0 : index
      %c0_12 = arith.constant 0 : index
      %13 = vector.load %arg7[%c0_11, %c0_12] : memref<256x128xf32, #tpu.memory_space<vmem>>, vector<256x128xf32>
      tpu.vector_store %arg7[%c0_11, %c0_12], %12 {strides = array<i32>} : memref<256x128xf32, #tpu.memory_space<vmem>>, vector<256x128xf32>,
    } else {
    }
    %c0 = arith.constant 0 : index
    %c0_1 = arith.constant 0 : index
    %3 = vector.load %arg7[%c0, %c0_1] : memref<256x128xf32, #tpu.memory_space<vmem>>, vector<256x128xf32>
    %c0_2 = arith.constant 0 : index
    %c0_3 = arith.constant 0 : index
    %4 = vector.load %arg2[%c0_2, %c0_3] : memref<256x256xbf16, #tpu.memory_space<vmem>>, vector<256x256xbf16>
    %c0_4 = arith.constant 0 : index
    %c0_5 = arith.constant 0 : index
    %5 = vector.load %arg3[%c0_4, %c0_5] : memref<256x128xbf16, #tpu.memory_space<vmem>>, vector<256x128xbf16>
    %cst = arith.constant dense<0.000000e+00> : vector<256x128xf32>
    %6 = tpu.matmul %4, %5, %cst {dimension_numbers = #tpu.dot_dimension_numbers<[1], [0], [0], [1], [0, 0, 1, 1], [], []>} : vector<256x256xbf16>, vector<256x128xbf16>, vector<256x128xf32> -> vector<256x128xf32>
    %7 = arith.addf %3, %6 : vector<256x128xf32>
    %c0_6 = arith.constant 0 : index
    %c0_7 = arith.constant 0 : index
    %8 = vector.load %arg7[%c0_6, %c0_7] : memref<256x128xf32, #tpu.memory_space<vmem>>, vector<256x128xf32>
    tpu.vector_store %arg7[%c0_6, %c0_7], %7 {strides = array<i32>} : memref<256x128xf32, #tpu.memory_space<vmem>>, vector<256x128xf32>,
    %c0_i32_8 = arith.constant 0 : i32
    %9 = arith.cmpi eq, %arg1, %c0_i32_8 : i32
    %10 = arith.extui %9 : i1 to i32
    %c0_i32_9 = arith.constant 0 : i32
    %11 = arith.cmpi ne, %10, %c0_i32_9 : i32
    scf.if %11 {
      %c0_10 = arith.constant 0 : index
      %c0_11 = arith.constant 0 : index
      %12 = vector.load %arg5[%c0_10, %c0_11] : memref<2x128xf32, #tpu.memory_space<vmem>>, vector<1x128xf32>
      %c1 = arith.constant 1 : index
      %c0_12 = arith.constant 0 : index
      %13 = vector.load %arg5[%c1, %c0_12] : memref<2x128xf32, #tpu.memory_space<vmem>>, vector<1x128xf32>
      %c0_13 = arith.constant 0 : index
      %c0_14 = arith.constant 0 : index
      %14 = vector.load %arg7[%c0_13, %c0_14] : memref<256x128xf32, #tpu.memory_space<vmem>>, vector<256x128xf32>
      %15 = vector.broadcast %12 : vector<1x128xf32> to vector<256x128xf32>
      %16 = arith.addf %14, %15 : vector<256x128xf32>
      %cst_15 = arith.constant 0.000000e+00 : f32
      %17 = vector.broadcast %cst_15 : f32 to vector<256x128xf32>
      %18 = arith.maximumf %16, %17 : vector<256x128xf32>
      %19 = arith.truncf %18 : vector<256x128xf32> to vector<256x128xbf16>
      %c0_16 = arith.constant 0 : index
      %c0_17 = arith.constant 0 : index
      %20 = vector.load %arg4[%c0_16, %c0_17] : memref<128x128xbf16, #tpu.memory_space<vmem>>, vector<128x128xbf16>
      %cst_18 = arith.constant dense<0.000000e+00> : vector<256x128xf32>
      %21 = tpu.matmul %19, %20, %cst_18 {dimension_numbers = #tpu.dot_dimension_numbers<[1], [0], [0], [1], [0, 0, 1, 1], [], []>} : vector<256x128xbf16>, vector<128x128xbf16>, vector<256x128xf32> -> vector<256x128xf32>
      %22 = vector.broadcast %13 : vector<1x128xf32> to vector<256x128xf32>
      %23 = arith.addf %21, %22 : vector<256x128xf32>
      %24 = arith.truncf %23 : vector<256x128xf32> to vector<256x128xbf16>
      %c0_19 = arith.constant 0 : index
      %c0_20 = arith.constant 0 : index
      %25 = vector.load %arg6[%c0_19, %c0_20] : memref<256x128xbf16, #tpu.memory_space<vmem>>, vector<256x128xbf16>
      tpu.vector_store %arg6[%c0_19, %c0_20], %24 {strides = array<i32>} : memref<256x128xbf16, #tpu.memory_space<vmem>>, vector<256x128xbf16>,
    } else {
    }
    return
  }
  func.func @transform_0(%arg0: i32, %arg1: i32) -> (i32, i32) {
    %c0_i32 = arith.constant 0 : i32
    return %arg0, %arg1 : i32, i32
  }
  func.func @transform_1(%arg0: i32, %arg1: i32) -> (i32, i32) {
    %c0_i32 = arith.constant 0 : i32
    %c0_i32_0 = arith.constant 0 : i32
    return %arg1, %c0_i32 : i32, i32
  }
  func.func @transform_2(%arg0: i32, %arg1: i32) -> (i32, i32) {
    %c0_i32 = arith.constant 0 : i32
    %c0_i32_0 = arith.constant 0 : i32
    %c0_i32_1 = arith.constant 0 : i32
    return %c0_i32, %c0_i32_0 : i32, i32
  }
  func.func @transform_3(%arg0: i32, %arg1: i32) -> (i32, i32) {
    %c0_i32 = arith.constant 0 : i32
    %c0_i32_0 = arith.constant 0 : i32
    %c0_i32_1 = arith.constant 0 : i32
    return %c0_i32, %c0_i32_0 : i32, i32
  }
  func.func @transform_4(%arg0: i32, %arg1: i32) -> (i32, i32) {
    %c0_i32 = arith.constant 0 : i32
    %c0_i32_0 = arith.constant 0 : i32
    return %arg0, %c0_i32 : i32, i32
  }
}

</mosaic_0001>

<bundles_post_ra>
// kernel: tpu_custom_call.1
= control target key start
LH: loop header
LB: loop body
LE: loop exit
PB: predicated region body
PF: predicated region fallthrough
CT: control target
= control target key end

     0   :  { %9 = vsyncpa [#allocation4], 0  ;;  %s1968_s0 = inlined_call_operand.hbm [shape: bf16[256,256], index: 0, kind: input, shape index: {}]   ;;  %s1969_s1 = inlined_call_operand.hbm [shape: bf16[256,128], index: 1, kind: input, shape index: {}]   ;;  %s1970_s2 = inlined_call_operand.hbm [shape: bf16[128,128], index: 2, kind: input, shape index: {}]   ;;  %s1971_s3 = inlined_call_operand.vmem [shape: f32[2,128], index: 3, kind: input, shape index: {}]   ;;  %s1972_s4 = inlined_call_operand.hbm [shape: bf16[256,128], index: 4, kind: output, shape index: {}]  }
   0x1   :  { %10 = vsyncpa [#allocation7], 0 }
   0x2   :  { %11 = vsyncpa [#allocation5], 0  ;;  %s1792_s15 = smov [#allocation6]   ;;  %s1698_s19 = scalar_lea.hbm %s1969_s1, 2048 }
   0x3   :  { %s29_s16 = sshll.u32 %s1792_s15, 4  ;;  %p1699_p0 = scmp.ne.s32.totalorder %s1969_s1, %s1698_s19  ;;  %s30_s16 = int_to_ptr.vmem [resolvable:$true] %s29_s16 }
   0x4   :  { %p1702_p1 = scmp.lt.u32.totalorder %s1698_s19, %s1969_s1 }
   0x6   :  { %p1704_p2 = pnand %p1702_p1, %p1699_p0 }
   0x8   :  { %1707 = shalt.err (!%p1704_p2)
}
   0x9   :  { %s1708_s24 = scalar_lea.vmem %s30_s16, 2048  ;;  %p1713_p4 = scmp.lt.s32.totalorder %s30_s16, %s30_s16 }
   0xa   :  { %p1709_p3 = scmp.ne.s32.totalorder %s30_s16, %s1708_s24  ;;  %p1714_p5 = scmp.lt.s32.totalorder %s1708_s24, %s1708_s24 }
   0xc   :  { %p1715_p6 = por %p1714_p5, %p1713_p4 }
   0xe   :  { %p1716_p7 = pnand %p1715_p6, %p1709_p3 }
  0x10   :  { %1719 = shalt.err (!%p1716_p7)
}
  0x11   :  { %s1793_s25 = smov 64   ;;  %s1794_s26 = smov 4  }
  0x12   :  { %35 = dma.hbm_to_vmem [thread:$0]  %s1969_s1, 2048, %s30_s16, [#allocation7], %s1793_s25, %s1793_s25, %s1794_s26  }
  0x13   :  { %s1795_s29 = smov [#allocation3]   ;;  %s1720_s7 = scalar_lea.hbm %s1968_s0, 4096 }
  0x14   :  { %s17_s30 = sshll.u32 %s1795_s29, 4  ;;  %p1721_p8 = scmp.ne.s32.totalorder %s1968_s0, %s1720_s7  ;;  %s18_s30 = int_to_ptr.vmem [resolvable:$true] %s17_s30 }
  0x15   :  { %p1724_p9 = scmp.lt.u32.totalorder %s1720_s7, %s1968_s0 }
  0x17   :  { %p1726_p10 = pnand %p1724_p9, %p1721_p8 }
  0x19   :  { %1729 = shalt.err (!%p1726_p10)
}
  0x1a   :  { %s1730_s12 = scalar_lea.vmem %s18_s30, 4096  ;;  %p1735_p12 = scmp.lt.s32.totalorder %s18_s30, %s18_s30 }
  0x1b   :  { %p1731_p11 = scmp.ne.s32.totalorder %s18_s30, %s1730_s12  ;;  %p1736_p13 = scmp.lt.s32.totalorder %s1730_s12, %s1730_s12 }
  0x1d   :  { %p1737_p0 = por %p1736_p13, %p1735_p12 }
  0x1f   :  { %p1738_p1 = pnand %p1737_p0, %p1731_p11 }
  0x21   :  { %1741 = shalt.err (!%p1738_p1)
}
  0x22   :  { %s1796_s1 = smov 128   ;;  %s1797_s13 = smov 8  }
  0x23   :  { %23 = dma.hbm_to_vmem [thread:$0]  %s1968_s0, 4096, %s18_s30, [#allocation4], %s1796_s1, %s1796_s1, %s1797_s13  }
  0x24   :  { %s1798_s16 = smov [#allocation8]   ;;  %s1742_s20 = scalar_lea.hbm %s1970_s2, 1024 }
  0x25   :  { %s41_s17 = sshll.u32 %s1798_s16, 4  ;;  %p1743_p2 = scmp.ne.s32.totalorder %s1970_s2, %s1742_s20  ;;  %s42_s17 = int_to_ptr.vmem [resolvable:$true] %s41_s17 }
  0x26   :  { %p1746_p3 = scmp.lt.u32.totalorder %s1742_s20, %s1970_s2 }
  0x28   :  { %p1748_p4 = pnand %p1746_p3, %p1743_p2 }
  0x2a   :  { %1751 = shalt.err (!%p1748_p4)
}
  0x2b   :  { %s1752_s27 = scalar_lea.vmem %s42_s17, 1024  ;;  %p1757_p6 = scmp.lt.s32.totalorder %s42_s17, %s42_s17 }
  0x2c   :  { %p1753_p5 = scmp.ne.s32.totalorder %s42_s17, %s1752_s27  ;;  %p1758_p7 = scmp.lt.s32.totalorder %s1752_s27, %s1752_s27 }
  0x2e   :  { %p1759_p8 = por %p1758_p7, %p1757_p6 }
  0x30   :  { %p1760_p9 = pnand %p1759_p8, %p1753_p5 }
  0x32   :  { %1763 = shalt.err (!%p1760_p9)
}
  0x33   :  { %47 = dma.hbm_to_vmem [thread:$0]  %s1970_s2, 1024, %s42_s17, [#allocation7], %s1793_s25, %s1793_s25, %s1794_s26  }
  0x34   :  { %1786 = dma.done.wait [#allocation4], 4096  }
  0x35   :  { %1787 = vsyncadd [#allocation4], 4294963200 }
  0x36   :  { %1788 = dma.done.wait [#allocation7], 3072  }
  0x37   :  { %1789 = vsyncadd [#allocation7], 4294964224  ;;  %v1626_v0 = vld [vmem:[#allocation6 + $0x40] sm:$0xff]   ;;  %v1628_v2 = vld [vmem:[#allocation6 + $0x48] sm:$0xff]  }
  0x38   :  { %v1627_v1 = vld [vmem:[#allocation6] sm:$0xff]   ;;  %1418 = vmatprep.subr.bf16.mxu0 %v1626_v0  ;;  %1602 = vmatprep.subr.bf16.mxu1 %v1626_v0  ;;  %v1629_v3 = vld [vmem:[#allocation6 + $0x8] sm:$0xff]   ;;  %v1630_v4 = vld [vmem:[#allocation6 + $0x50] sm:$0xff]  }
  0x39   :  { %1419 = vmatpush3.bf16.msra.mxu0 %v1627_v1  ;;  %1610 = vmatpush3.bf16.msra.mxu1 %v1627_v1  ;;  %v1631_v5 = vld [vmem:[#allocation6 + $0x10] sm:$0xff]   ;;  %v1632_v6 = vld [vmem:[#allocation6 + $0x58] sm:$0xff]   ;;  %v1634_v8 = vld [vmem:[#allocation6 + $0x60] sm:$0xff]  }
  0x3a   :  { %1420 = vmatprep.subr.bf16.mxu0 %v1628_v2  ;;  %1603 = vmatprep.subr.bf16.mxu1 %v1628_v2  ;;  %v1633_v7 = vld [vmem:[#allocation6 + $0x18] sm:$0xff]   ;;  %v1635_v9 = vld [vmem:[#allocation6 + $0x20] sm:$0xff]   ;;  %v1636_v10 = vld [vmem:[#allocation6 + $0x68] sm:$0xff]  }
  0x3b   :  { %v1644_v11 = vld [vmem:[#allocation3 + $0x4] ss:$8 sps:$4 sm:$0xff]   ;;  %v1638_v13 = vld [vmem:[#allocation6 + $0x70] sm:$0xff]   ;;  %v1640_v15 = vld [vmem:[#allocation6 + $0x78] sm:$0xff]  }
  0x3c   :  { %v1637_v12 = vld [vmem:[#allocation6 + $0x28] sm:$0xff]   ;;  %480 = vmatprep.mubr.bf16.mxu0 %v1644_v11  ;;  %v1639_v14 = vld [vmem:[#allocation6 + $0x30] sm:$0xff]   ;;  %v1641_v16 = vld [vmem:[#allocation6 + $0x38] sm:$0xff]  }
  0x3d   :  { %1421 = vmatpush3.bf16.msra.mxu0 %v1629_v3  ;;  %1611 = vmatpush3.bf16.msra.mxu1 %v1629_v3  ;;  %v1642_v17 = vld [vmem:[#allocation3] ss:$8 sps:$4 sm:$0xff]   ;;  %v1674_v18 = vld [vmem:[#allocation3 + $0xc4] ss:$8 sps:$4 sm:$0xff]   ;;  %v1645_v19 = vld [vmem:[#allocation3 + $0x14] ss:$8 sps:$4 sm:$0xff]  }
  0x3e   :  { %1422 = vmatprep.subr.bf16.mxu0 %v1630_v4  ;;  %1604 = vmatprep.subr.bf16.mxu1 %v1630_v4  ;;  %v1672_v20 = vld [vmem:[#allocation3 + $0xc0] ss:$8 sps:$4 sm:$0xff]   ;;  %v1678_v21 = vld [vmem:[#allocation3 + $0xd4] ss:$8 sps:$4 sm:$0xff]   ;;  %v1647_v22 = vld [vmem:[#allocation3 + $0x10] ss:$8 sps:$4 sm:$0xff]  }
  0x3f   :  { %576 = vmatprep.mubr.bf16.mxu1 %v1674_v18  ;;  %v1648_v23 = vld [vmem:[#allocation3 + $0x24] ss:$8 sps:$4 sm:$0xff]   ;;  %v1680_v24 = vld [vmem:[#allocation3 + $0xd0] ss:$8 sps:$4 sm:$0xff]   ;;  %v1650_v29 = vld [vmem:[#allocation3 + $0x20] ss:$8 sps:$4 sm:$0xff]  }
  0x40   :  { %v1684_v25 = vld [vmem:[#allocation3 + $0xe4] ss:$8 sps:$4 sm:$0xff]   ;;  %v1692_v28 = vld [vmem:[#allocation8 + $0x10] sm:$0xff]   ;;  %v1686_v31 = vld [vmem:[#allocation3 + $0xe0] ss:$8 sps:$4 sm:$0xff]  }
  0x41   :  { %1423 = vmatpush3.bf16.msra.mxu0 %v1631_v5  ;;  %1612 = vmatpush3.bf16.msra.mxu1 %v1631_v5  ;;  %v1690_v26 = vld [vmem:[#allocation8] sm:$0xff]   ;;  %v1691_v27 = vld [vmem:[#allocation8 + $0x8] sm:$0xff]   ;;  %v1651_v30 = vld [vmem:[#allocation3 + $0x34] ss:$8 sps:$4 sm:$0xff]  }
  0x42   :  { %1424 = vmatprep.subr.bf16.mxu0 %v1632_v6  ;;  %1605 = vmatprep.subr.bf16.mxu1 %v1632_v6  ;;  %v1687_v32 = vld [vmem:[#allocation3 + $0xf4] ss:$8 sps:$4 sm:$0xff]   ;;  %v1653_v33 = vld [vmem:[#allocation3 + $0x30] ss:$8 sps:$4 sm:$0xff]   ;;  %v1654_v34 = vld [vmem:[#allocation3 + $0x44] ss:$8 sps:$4 sm:$0xff]  }
  0x43   :  { %v1689_v35 = vld [vmem:[#allocation3 + $0xf0] ss:$8 sps:$4 sm:$0xff]   ;;  %v1656_v36 = vld [vmem:[#allocation3 + $0x40] ss:$8 sps:$4 sm:$0xff]   ;;  %v1657_v37 = vld [vmem:[#allocation3 + $0x54] ss:$8 sps:$4 sm:$0xff]  }
  0x44   :  { %v1659_v38 = vld [vmem:[#allocation3 + $0x50] ss:$8 sps:$4 sm:$0xff]   ;;  %v1660_v39 = vld [vmem:[#allocation3 + $0x64] ss:$8 sps:$4 sm:$0xff]   ;;  %v1662_v40 = vld [vmem:[#allocation3 + $0x60] ss:$8 sps:$4 sm:$0xff]  }
  0x45   :  { %1425 = vmatpush3.bf16.msra.mxu0 %v1633_v7  ;;  %1613 = vmatpush3.bf16.msra.mxu1 %v1633_v7  ;;  %v1663_v41 = vld [vmem:[#allocation3 + $0x74] ss:$8 sps:$4 sm:$0xff]   ;;  %v1665_v42 = vld [vmem:[#allocation3 + $0x70] ss:$8 sps:$4 sm:$0xff]   ;;  %v1666_v43 = vld [vmem:[#allocation3 + $0x84] ss:$8 sps:$4 sm:$0xff]  }
  0x46   :  { %1426 = vmatprep.subr.bf16.mxu0 %v1634_v8  ;;  %1606 = vmatprep.subr.bf16.mxu1 %v1634_v8  ;;  %v1668_v44 = vld [vmem:[#allocation3 + $0x80] ss:$8 sps:$4 sm:$0xff]   ;;  %v1669_v45 = vld [vmem:[#allocation3 + $0x94] ss:$8 sps:$4 sm:$0xff]   ;;  %v1671_v46 = vld [vmem:[#allocation3 + $0x90] ss:$8 sps:$4 sm:$0xff]  }
  0x47   :  { %v1675_v47 = vld [vmem:[#allocation3 + $0xa4] ss:$8 sps:$4 sm:$0xff]   ;;  %v1677_v48 = vld [vmem:[#allocation3 + $0xa0] ss:$8 sps:$4 sm:$0xff]   ;;  %v1681_v49 = vld [vmem:[#allocation3 + $0xb4] ss:$8 sps:$4 sm:$0xff]  }
  0x48   :  { %v1693_v50 = vld [vmem:[#allocation8 + $0x18] sm:$0xff]   ;;  %v1694_v52 = vld [vmem:[#allocation8 + $0x20] sm:$0xff]   ;;  %v1695_v53 = vld [vmem:[#allocation8 + $0x28] sm:$0xff]  }
  0x49   :  { %1427 = vmatpush3.bf16.msra.mxu0 %v1635_v9  ;;  %1614 = vmatpush3.bf16.msra.mxu1 %v1635_v9  ;;  %v1683_v51 = vld [vmem:[#allocation3 + $0xb0] ss:$8 sps:$4 sm:$0xff]   ;;  %v1870_v58 = vld [vmem:[%s1971_s3] ss:$0 sm:$0xff] }
  0x4a   :  { %1428 = vmatprep.subr.bf16.mxu0 %v1636_v10  ;;  %1607 = vmatprep.subr.bf16.mxu1 %v1636_v10  ;;  %v1696_v54 = vld [vmem:[#allocation8 + $0x30] sm:$0xff]   ;;  %v1697_v55 = vld [vmem:[#allocation8 + $0x38] sm:$0xff]  }
  0x4d   :  { %1429 = vmatpush3.bf16.msra.mxu0 %v1637_v12  ;;  %1615 = vmatpush3.bf16.msra.mxu1 %v1637_v12 }
  0x4e   :  { %1430 = vmatprep.subr.bf16.mxu0 %v1638_v13  ;;  %1608 = vmatprep.subr.bf16.mxu1 %v1638_v13 }
  0x51   :  { %1431 = vmatpush3.bf16.msra.mxu0 %v1639_v14  ;;  %1616 = vmatpush3.bf16.msra.mxu1 %v1639_v14 }
  0x52   :  { %1432 = vmatprep.subr.bf16.mxu0 %v1640_v15  ;;  %1609 = vmatprep.subr.bf16.mxu1 %v1640_v15 }
  0x55   :  { %1433 = vmatpush3.bf16.msra.mxu0 %v1641_v16  ;;  %1617 = vmatpush3.bf16.msra.mxu1 %v1641_v16 }
  0x56   :  { %1554 = vmatprep.subr.bf16.mxu1 %v1690_v26 }
  0x58   :  { %481 = vmatmul.mubr.bf16.vlgmr.msra.gmra.mrb[0].mxu0 %v1642_v17  ;;  %577 = vmatmul.mubr.bf16.vlgmr.msra.gmra.mrb[0].mxu1 %v1672_v20 }
  0x59   :  { %488 = vmatprep.mubr.bf16.mxu0 %v1645_v19  ;;  %584 = vmatprep.mubr.bf16.mxu1 %v1678_v21 }
  0x5a   :  { %1555 = vmatpush3.bf16.msra.mxu1 %v1690_v26 }
  0x5b   :  { %1556 = vmatprep.subr.bf16.mxu1 %v1691_v27 }
  0x5e   :  { %1557 = vmatpush3.bf16.msra.mxu1 %v1691_v27 }
  0x5f   :  { %1558 = vmatprep.subr.bf16.mxu1 %v1692_v28 }
  0x60   :  { %489 = vmatmul.mubr.bf16.gmra.mrb[4].mxu0 %v1647_v22  ;;  %585 = vmatmul.mubr.bf16.gmra.mrb[4].mxu1 %v1680_v24 }
  0x61   :  { %496 = vmatprep.mubr.bf16.mxu0 %v1648_v23  ;;  %592 = vmatprep.mubr.bf16.mxu1 %v1684_v25 }
  0x62   :  { %1559 = vmatpush3.bf16.msra.mxu1 %v1692_v28 }
  0x63   :  { %1560 = vmatprep.subr.bf16.mxu1 %v1693_v50 }
  0x66   :  { %1561 = vmatpush3.bf16.msra.mxu1 %v1693_v50 }
  0x67   :  { %1562 = vmatprep.subr.bf16.mxu1 %v1694_v52 }
  0x68   :  { %497 = vmatmul.mubr.bf16.gmra.mrb[8].mxu0 %v1650_v29  ;;  %593 = vmatmul.mubr.bf16.gmra.mrb[8].mxu1 %v1686_v31 }
  0x69   :  { %504 = vmatprep.mubr.bf16.mxu0 %v1651_v30  ;;  %600 = vmatprep.mubr.bf16.mxu1 %v1687_v32 }
  0x6a   :  { %1563 = vmatpush3.bf16.msra.mxu1 %v1694_v52 }
  0x6b   :  { %1564 = vmatprep.subr.bf16.mxu1 %v1695_v53 }
  0x6e   :  { %1565 = vmatpush3.bf16.msra.mxu1 %v1695_v53 }
  0x6f   :  { %1566 = vmatprep.subr.bf16.mxu1 %v1696_v54 }
  0x70   :  { %505 = vmatmul.mubr.bf16.gmra.mrb[12].mxu0 %v1653_v33  ;;  %601 = vmatmul.mubr.bf16.gmra.mrb[12].mxu1 %v1689_v35 }
  0x71   :  { %512 = vmatprep.mubr.bf16.mxu0 %v1654_v34 }
  0x72   :  { %1567 = vmatpush3.bf16.msra.mxu1 %v1696_v54 }
  0x73   :  { %1568 = vmatprep.subr.bf16.mxu1 %v1697_v55 }
  0x76   :  { %1569 = vmatpush3.bf16.msra.mxu1 %v1697_v55 }
  0x78   :  { %513 = vmatmul.mubr.bf16.gmra.mrb[16].mxu0 %v1656_v36 }
  0x79   :  { %520 = vmatprep.mubr.bf16.mxu0 %v1657_v37 }
  0x80   :  { %521 = vmatmul.mubr.bf16.gmra.mrb[20].mxu0 %v1659_v38 }
  0x81   :  { %528 = vmatprep.mubr.bf16.mxu0 %v1660_v39 }
  0x88   :  { %529 = vmatmul.mubr.bf16.gmra.mrb[24].mxu0 %v1662_v40 }
  0x89   :  { %536 = vmatprep.mubr.bf16.mxu0 %v1663_v41 }
  0x90   :  { %537 = vmatmul.mubr.bf16.gmra.mrb[28].mxu0 %v1665_v42 }
  0x91   :  { %544 = vmatprep.mubr.bf16.mxu0 %v1666_v43 }
  0x98   :  { %545 = vmatmul.mubr.bf16.gmra.mrb[32].mxu0 %v1668_v44 }
  0x99   :  { %552 = vmatprep.mubr.bf16.mxu0 %v1669_v45 }
  0xa0   :  { %553 = vmatmul.mubr.bf16.gmra.mrb[36].mxu0 %v1671_v46 }
  0xa1   :  { %560 = vmatprep.mubr.bf16.mxu0 %v1675_v47 }
  0xa8   :  { %561 = vmatmul.mubr.bf16.gmra.mrb[40].mxu0 %v1677_v48 }
  0xa9   :  { %568 = vmatprep.mubr.bf16.mxu0 %v1681_v49 }
  0xb0   :  { %569 = vmatmul.mubr.bf16.gmra.mrb[44].mxu0 %v1683_v51 }
 0x12b   :  { %v1434_v56 = vpop.f32.mrb[0].mxu0  ;;  %v1506_v59 = vpop.f32.mrb[0].mxu1 }
 0x12c   :  { %v1435_v57 = vpop.f32.mrb[1].mxu0  ;;  %v1507_v62 = vpop.f32.mrb[1].mxu1 }
 0x12d   :  { %v1436_v60 = vadd.f32 %v1435_v57, %v1434_v56  ;;  %v1437_v61 = vpop.f32.mrb[2].mxu0  ;;  %v1508_v0 = vadd.f32 %v1507_v62, %v1506_v59  ;;  %v1509_v1 = vpop.f32.mrb[2].mxu1 }
 0x12e   :  { %v1438_v63 = vpop.f32.mrb[3].mxu0  ;;  %v1510_v4 = vpop.f32.mrb[3].mxu1 }
 0x12f   :  { %v714_v2 = vadd.f32 %v1436_v60, %v1870_v58  ;;  %v1439_v3 = vadd.f32 %v1438_v63, %v1437_v61  ;;  %v738_v5 = vadd.f32 %v1508_v0, %v1870_v58  ;;  %v1511_v6 = vadd.f32 %v1510_v4, %v1509_v1 }
 0x131   :  { %v715_v7 = vadd.f32 %v1439_v3, %v1870_v58  ;;  %v770_v8 = vmax.f32 %v738_v5, 0.0  ;;  %v739_v9 = vadd.f32 %v1511_v6, %v1870_v58  ;;  %v746_v10 = vmax.f32 %v714_v2, 0.0 }
 0x133   :  { %v747_v11 = vmax.f32 %v715_v7, 0.0  ;;  %v1440_v12 = vpop.f32.mrb[4].mxu0  ;;  %v771_v14 = vmax.f32 %v739_v9, 0.0  ;;  %v1512_v15 = vpop.f32.mrb[4].mxu1 }
 0x134   :  { %v1441_v13 = vpop.f32.mrb[5].mxu0  ;;  %v1513_v19 = vpop.f32.mrb[5].mxu1 }
 0x135   :  { %v1442_v16 = vadd.f32 %v1441_v13, %v1440_v12  ;;  %v1443_v17 = vpop.f32.mrb[6].mxu0  ;;  %v778_v18 = vpack.c.bf16 %v747_v11, %v746_v10  ;;  %v1514_v21 = vadd.f32 %v1513_v19, %v1512_v15  ;;  %v1515_v22 = vpop.f32.mrb[6].mxu1  ;;  %v1876_v23 = vpack.c.bf16 %v771_v14, %v770_v8 }
 0x136   :  { %v1444_v20 = vpop.f32.mrb[7].mxu0  ;;  %v1516_v26 = vpop.f32.mrb[7].mxu1 }
 0x137   :  { %v716_v24 = vadd.f32 %v1442_v16, %v1870_v58  ;;  %v1445_v25 = vadd.f32 %v1444_v20, %v1443_v17  ;;  %1570 = vmatprep.mubr.bf16.mxu1 %v778_v18  ;;  %v740_v27 = vadd.f32 %v1514_v21, %v1870_v58  ;;  %v1517_v28 = vadd.f32 %v1516_v26, %v1515_v22 }
 0x139   :  { %v717_v29 = vadd.f32 %v1445_v25, %v1870_v58  ;;  %v772_v30 = vmax.f32 %v740_v27, 0.0  ;;  %v741_v31 = vadd.f32 %v1517_v28, %v1870_v58  ;;  %v748_v32 = vmax.f32 %v716_v24, 0.0 }
 0x13b   :  { %v749_v33 = vmax.f32 %v717_v29, 0.0  ;;  %v1446_v34 = vpop.f32.mrb[8].mxu0  ;;  %v773_v36 = vmax.f32 %v741_v31, 0.0  ;;  %v1518_v37 = vpop.f32.mrb[8].mxu1 }
 0x13c   :  { %v1447_v35 = vpop.f32.mrb[9].mxu0  ;;  %v1519_v41 = vpop.f32.mrb[9].mxu1 }
 0x13d   :  { %v779_v38 = vpack.c.bf16 %v749_v33, %v748_v32  ;;  %v1448_v39 = vadd.f32 %v1447_v35, %v1446_v34  ;;  %v1449_v40 = vpop.f32.mrb[10].mxu0  ;;  %v1520_v43 = vadd.f32 %v1519_v41, %v1518_v37  ;;  %v1521_v44 = vpop.f32.mrb[10].mxu1  ;;  %v1882_v45 = vpack.c.bf16 %v773_v36, %v772_v30 }
 0x13e   :  { %v1450_v42 = vpop.f32.mrb[11].mxu0  ;;  %v1522_v48 = vpop.f32.mrb[11].mxu1 }
 0x13f   :  { %v718_v46 = vadd.f32 %v1448_v39, %v1870_v58  ;;  %v1451_v47 = vadd.f32 %v1450_v42, %v1449_v40  ;;  %1571 = vmatmul.mubr.bf16.vlgmr.msra.gmra.mrb[16].mxu1 %v779_v38  ;;  %v742_v49 = vadd.f32 %v1520_v43, %v1870_v58  ;;  %v1523_v50 = vadd.f32 %v1522_v48, %v1521_v44 }
 0x141   :  { %v719_v51 = vadd.f32 %v1451_v47, %v1870_v58  ;;  %v774_v52 = vmax.f32 %v742_v49, 0.0  ;;  %v743_v53 = vadd.f32 %v1523_v50, %v1870_v58  ;;  %v750_v54 = vmax.f32 %v718_v46, 0.0 }
 0x143   :  { %v751_v55 = vmax.f32 %v719_v51, 0.0  ;;  %v1452_v56 = vpop.f32.mrb[12].mxu0  ;;  %v775_v59 = vmax.f32 %v743_v53, 0.0  ;;  %v1524_v60 = vpop.f32.mrb[12].mxu1 }
 0x144   :  { %v1453_v57 = vpop.f32.mrb[13].mxu0  ;;  %v1525_v0 = vpop.f32.mrb[13].mxu1 }
 0x145   :  { %v1454_v61 = vadd.f32 %v1453_v57, %v1452_v56  ;;  %v1455_v62 = vpop.f32.mrb[14].mxu0  ;;  %v780_v63 = vpack.c.bf16 %v751_v55, %v750_v54  ;;  %v1526_v2 = vadd.f32 %v1525_v0, %v1524_v60  ;;  %v1527_v3 = vpop.f32.mrb[14].mxu1  ;;  %v1888_v4 = vpack.c.bf16 %v775_v59, %v774_v52 }
 0x146   :  { %v1456_v1 = vpop.f32.mrb[15].mxu0  ;;  %v1528_v7 = vpop.f32.mrb[15].mxu1 }
 0x147   :  { %v720_v5 = vadd.f32 %v1454_v61, %v1870_v58  ;;  %v1457_v6 = vadd.f32 %v1456_v1, %v1455_v62  ;;  %1574 = vmatprep.mubr.bf16.mxu1 %v780_v63  ;;  %v744_v8 = vadd.f32 %v1526_v2, %v1870_v58  ;;  %v1529_v9 = vadd.f32 %v1528_v7, %v1527_v3 }
 0x149   :  { %v721_v10 = vadd.f32 %v1457_v6, %v1870_v58  ;;  %v776_v11 = vmax.f32 %v744_v8, 0.0  ;;  %v745_v12 = vadd.f32 %v1529_v9, %v1870_v58  ;;  %v752_v13 = vmax.f32 %v720_v5, 0.0 }
 0x14b   :  { %v753_v14 = vmax.f32 %v721_v10, 0.0  ;;  %v1458_v15 = vpop.f32.mrb[16].mxu0  ;;  %v777_v17 = vmax.f32 %v745_v12, 0.0 }
 0x14c   :  { %v1459_v16 = vpop.f32.mrb[17].mxu0 }
 0x14d   :  { %v1460_v18 = vadd.f32 %v1459_v16, %v1458_v15  ;;  %v1461_v19 = vpop.f32.mrb[18].mxu0  ;;  %v781_v20 = vpack.c.bf16 %v753_v14, %v752_v13  ;;  %v1894_v22 = vpack.c.bf16 %v777_v17, %v776_v11 }
 0x14e   :  { %v1462_v21 = vpop.f32.mrb[19].mxu0 }
 0x14f   :  { %v722_v24 = vadd.f32 %v1460_v18, %v1870_v58  ;;  %v1463_v25 = vadd.f32 %v1462_v21, %v1461_v19  ;;  %1575 = vmatmul.mubr.bf16.gmra.mrb[20].mxu1 %v781_v20 }
 0x151   :  { %v723_v26 = vadd.f32 %v1463_v25, %v1870_v58  ;;  %v754_v27 = vmax.f32 %v722_v24, 0.0 }
 0x153   :  { %v755_v28 = vmax.f32 %v723_v26, 0.0  ;;  %v1464_v29 = vpop.f32.mrb[20].mxu0 }
 0x154   :  { %v1465_v30 = vpop.f32.mrb[21].mxu0 }
 0x155   :  { %v1466_v31 = vadd.f32 %v1465_v30, %v1464_v29  ;;  %v1467_v32 = vpop.f32.mrb[22].mxu0  ;;  %v782_v33 = vpack.c.bf16 %v755_v28, %v754_v27 }
 0x156   :  { %v1468_v34 = vpop.f32.mrb[23].mxu0 }
 0x157   :  { %v724_v35 = vadd.f32 %v1466_v31, %v1870_v58  ;;  %v1469_v36 = vadd.f32 %v1468_v34, %v1467_v32  ;;  %1578 = vmatprep.mubr.bf16.mxu1 %v782_v33 }
 0x159   :  { %v725_v37 = vadd.f32 %v1469_v36, %v1870_v58  ;;  %v756_v38 = vmax.f32 %v724_v35, 0.0 }
 0x15b   :  { %v757_v39 = vmax.f32 %v725_v37, 0.0  ;;  %v1470_v40 = vpop.f32.mrb[24].mxu0 }
 0x15c   :  { %v1471_v41 = vpop.f32.mrb[25].mxu0 }
 0x15d   :  { %v1472_v42 = vadd.f32 %v1471_v41, %v1470_v40  ;;  %v1473_v43 = vpop.f32.mrb[26].mxu0  ;;  %v783_v44 = vpack.c.bf16 %v757_v39, %v756_v38 }
 0x15e   :  { %v1474_v46 = vpop.f32.mrb[27].mxu0 }
 0x15f   :  { %v726_v47 = vadd.f32 %v1472_v42, %v1870_v58  ;;  %v1475_v48 = vadd.f32 %v1474_v46, %v1473_v43  ;;  %1579 = vmatmul.mubr.bf16.gmra.mrb[24].mxu1 %v783_v44 }
 0x161   :  { %v727_v49 = vadd.f32 %v1475_v48, %v1870_v58  ;;  %v758_v50 = vmax.f32 %v726_v47, 0.0 }
 0x163   :  { %v759_v51 = vmax.f32 %v727_v49, 0.0  ;;  %v1476_v52 = vpop.f32.mrb[28].mxu0 }
 0x164   :  { %v1477_v53 = vpop.f32.mrb[29].mxu0 }
 0x165   :  { %v1478_v54 = vadd.f32 %v1477_v53, %v1476_v52  ;;  %v1479_v55 = vpop.f32.mrb[30].mxu0  ;;  %v784_v56 = vpack.c.bf16 %v759_v51, %v758_v50  ;;  %v1919_v50 = vld [vmem:[%s1971_s3 + $0x1] ss:$0 sm:$0xff]  ;;  %s1799_s3 = smov [#allocation9]  }
 0x166   :  { %v1480_v57 = vpop.f32.mrb[31].mxu0  ;;  %s1188_s6 = sshll.u32 %s1799_s3, 4  ;;  %s1189_s6 = int_to_ptr.vmem [resolvable:$true] %s1188_s6 }
 0x167   :  { %v728_v59 = vadd.f32 %v1478_v54, %v1870_v58  ;;  %v1481_v60 = vadd.f32 %v1480_v57, %v1479_v55  ;;  %1582 = vmatprep.mubr.bf16.mxu1 %v784_v56  ;;  %s1764_s7 = scalar_lea.vmem %s1189_s6, 2048  ;;  %p1769_p11 = scmp.lt.s32.totalorder %s1189_s6, %s1189_s6 }
 0x168   :  { %p1765_p10 = scmp.ne.s32.totalorder %s1189_s6, %s1764_s7  ;;  %p1770_p12 = scmp.lt.s32.totalorder %s1764_s7, %s1764_s7 }
 0x169   :  { %v729_v61 = vadd.f32 %v1481_v60, %v1870_v58  ;;  %v760_v62 = vmax.f32 %v728_v59, 0.0 }
 0x16a   :  { %p1771_p13 = por %p1770_p12, %p1769_p11 }
 0x16b   :  { %v761_v63 = vmax.f32 %v729_v61, 0.0  ;;  %v1482_v0 = vpop.f32.mrb[32].mxu0 }
 0x16c   :  { %v1483_v1 = vpop.f32.mrb[33].mxu0  ;;  %p1772_p0 = pnand %p1771_p13, %p1765_p10 }
 0x16d   :  { %v1484_v2 = vadd.f32 %v1483_v1, %v1482_v0  ;;  %v1485_v3 = vpop.f32.mrb[34].mxu0  ;;  %v785_v5 = vpack.c.bf16 %v761_v63, %v760_v62 }
 0x16e   :  { %v1486_v6 = vpop.f32.mrb[35].mxu0 }
 0x16f   :  { %v730_v7 = vadd.f32 %v1484_v2, %v1870_v58  ;;  %v1487_v8 = vadd.f32 %v1486_v6, %v1485_v3  ;;  %1583 = vmatmul.mubr.bf16.gmra.mrb[28].mxu1 %v785_v5 }
 0x171   :  { %v731_v9 = vadd.f32 %v1487_v8, %v1870_v58  ;;  %v762_v10 = vmax.f32 %v730_v7, 0.0 }
 0x173   :  { %v763_v11 = vmax.f32 %v731_v9, 0.0  ;;  %v1488_v12 = vpop.f32.mrb[36].mxu0 }
 0x174   :  { %v1489_v13 = vpop.f32.mrb[37].mxu0 }
 0x175   :  { %v1490_v14 = vadd.f32 %v1489_v13, %v1488_v12  ;;  %v1491_v15 = vpop.f32.mrb[38].mxu0  ;;  %v786_v16 = vpack.c.bf16 %v763_v11, %v762_v10 }
 0x176   :  { %v1492_v17 = vpop.f32.mrb[39].mxu0 }
 0x177   :  { %v732_v18 = vadd.f32 %v1490_v14, %v1870_v58  ;;  %v1493_v19 = vadd.f32 %v1492_v17, %v1491_v15  ;;  %1586 = vmatprep.mubr.bf16.mxu1 %v786_v16 }
 0x179   :  { %v733_v20 = vadd.f32 %v1493_v19, %v1870_v58  ;;  %v764_v21 = vmax.f32 %v732_v18, 0.0 }
 0x17b   :  { %v765_v24 = vmax.f32 %v733_v20, 0.0  ;;  %v1494_v25 = vpop.f32.mrb[40].mxu0 }
 0x17c   :  { %v1495_v26 = vpop.f32.mrb[41].mxu0 }
 0x17d   :  { %v1496_v27 = vadd.f32 %v1495_v26, %v1494_v25  ;;  %v1497_v28 = vpop.f32.mrb[42].mxu0  ;;  %v787_v29 = vpack.c.bf16 %v765_v24, %v764_v21 }
 0x17e   :  { %v1498_v30 = vpop.f32.mrb[43].mxu0 }
 0x17f   :  { %v734_v31 = vadd.f32 %v1496_v27, %v1870_v58  ;;  %v1499_v32 = vadd.f32 %v1498_v30, %v1497_v28  ;;  %1587 = vmatmul.mubr.bf16.gmra.mrb[32].mxu1 %v787_v29 }
 0x181   :  { %v735_v33 = vadd.f32 %v1499_v32, %v1870_v58  ;;  %v766_v34 = vmax.f32 %v734_v31, 0.0 }
 0x183   :  { %v767_v35 = vmax.f32 %v735_v33, 0.0  ;;  %v1500_v36 = vpop.f32.mrb[44].mxu0 }
 0x184   :  { %v1501_v37 = vpop.f32.mrb[45].mxu0 }
 0x185   :  { %v1502_v38 = vadd.f32 %v1501_v37, %v1500_v36  ;;  %v1503_v39 = vpop.f32.mrb[46].mxu0  ;;  %v788_v40 = vpack.c.bf16 %v767_v35, %v766_v34 }
 0x186   :  { %v1504_v41 = vpop.f32.mrb[47].mxu0 }
 0x187   :  { %v736_v42 = vadd.f32 %v1502_v38, %v1870_v58  ;;  %v1505_v43 = vadd.f32 %v1504_v41, %v1503_v39  ;;  %1590 = vmatprep.mubr.bf16.mxu1 %v788_v40 }
 0x189   :  { %v737_v44 = vadd.f32 %v1505_v43, %v1870_v58  ;;  %v768_v46 = vmax.f32 %v736_v42, 0.0 }
 0x18b   :  { %v769_v47 = vmax.f32 %v737_v44, 0.0 }
 0x18d   :  { %v789_v48 = vpack.c.bf16 %v769_v47, %v768_v46 }
 0x18f   :  { %1591 = vmatmul.mubr.bf16.gmra.mrb[36].mxu1 %v789_v48 }
 0x190   :  { %1594 = vmatprep.mubr.bf16.mxu1 %v1876_v23 }
 0x197   :  { %1595 = vmatmul.mubr.bf16.gmra.mrb[40].mxu1 %v1882_v45 }
 0x198   :  { %1598 = vmatprep.mubr.bf16.mxu1 %v1888_v4 }
 0x19f   :  { %1599 = vmatmul.mubr.bf16.gmra.mrb[44].mxu1 %v1894_v22 }
 0x212   :  { %v1572_v49 = vpop.f32.mrb[16].mxu1 }
 0x213   :  { %v896_v51 = vpop.f32.mrb[17].mxu1  ;;  %v905_v52 = vadd.f32 %v1572_v49, %v1919_v50 }
 0x214   :  { %v1573_v58 = vpop.f32.mrb[18].mxu1  ;;  %v897_v23 = vadd.f32 %v1919_v50, %v896_v51 }
 0x215   :  { %v908_v53 = vadd.f32 %v1573_v58, %v1919_v50  ;;  %v899_v54 = vpop.f32.mrb[19].mxu1 }
 0x216   :  { %v900_v45 = vadd.f32 %v1919_v50, %v899_v54 }
 0x217   :  { %v1331_v4 = vpack.c.bf16 %v908_v53, %v905_v52 }
 0x218   :  { %v1326_v55 = vpack.c.bf16 %v900_v45, %v897_v23 }
 0x219   :  { %1403 = vst [vmem:[#allocation9 + $0x8] sm:$0xff] %v1331_v4  }
 0x21a   :  { %1327 = vst [vmem:[#allocation9] sm:$0xff] %v1326_v55  }
 0x222   :  { %v1576_v22 = vpop.f32.mrb[20].mxu1 }
 0x223   :  { %v912_v56 = vpop.f32.mrb[21].mxu1  ;;  %v921_v59 = vadd.f32 %v1576_v22, %v1919_v50 }
 0x224   :  { %v1577_v57 = vpop.f32.mrb[22].mxu1  ;;  %v913_v62 = vadd.f32 %v1919_v50, %v912_v56 }
 0x225   :  { %v924_v60 = vadd.f32 %v1577_v57, %v1919_v50  ;;  %v915_v61 = vpop.f32.mrb[23].mxu1 }
 0x226   :  { %v916_v63 = vadd.f32 %v1919_v50, %v915_v61 }
 0x227   :  { %v1341_v0 = vpack.c.bf16 %v924_v60, %v921_v59 }
 0x228   :  { %v1336_v1 = vpack.c.bf16 %v916_v63, %v913_v62 }
 0x229   :  { %1405 = vst [vmem:[#allocation9 + $0x18] sm:$0xff] %v1341_v0  }
 0x22a   :  { %1404 = vst [vmem:[#allocation9 + $0x10] sm:$0xff] %v1336_v1  }
 0x232   :  { %v1580_v2 = vpop.f32.mrb[24].mxu1 }
 0x233   :  { %v928_v3 = vpop.f32.mrb[25].mxu1  ;;  %v937_v6 = vadd.f32 %v1580_v2, %v1919_v50 }
 0x234   :  { %v1581_v5 = vpop.f32.mrb[26].mxu1  ;;  %v929_v9 = vadd.f32 %v1919_v50, %v928_v3 }
 0x235   :  { %v940_v7 = vadd.f32 %v1581_v5, %v1919_v50  ;;  %v931_v8 = vpop.f32.mrb[27].mxu1 }
 0x236   :  { %v932_v10 = vadd.f32 %v1919_v50, %v931_v8 }
 0x237   :  { %v1351_v11 = vpack.c.bf16 %v940_v7, %v937_v6 }
 0x238   :  { %v1346_v12 = vpack.c.bf16 %v932_v10, %v929_v9 }
 0x239   :  { %1407 = vst [vmem:[#allocation9 + $0x28] sm:$0xff] %v1351_v11  }
 0x23a   :  { %1406 = vst [vmem:[#allocation9 + $0x20] sm:$0xff] %v1346_v12  }
 0x242   :  { %v1584_v13 = vpop.f32.mrb[28].mxu1 }
 0x243   :  { %v944_v14 = vpop.f32.mrb[29].mxu1  ;;  %v953_v16 = vadd.f32 %v1584_v13, %v1919_v50 }
 0x244   :  { %v1585_v15 = vpop.f32.mrb[30].mxu1  ;;  %v945_v19 = vadd.f32 %v1919_v50, %v944_v14 }
 0x245   :  { %v956_v17 = vadd.f32 %v1585_v15, %v1919_v50  ;;  %v947_v18 = vpop.f32.mrb[31].mxu1 }
 0x246   :  { %v948_v20 = vadd.f32 %v1919_v50, %v947_v18 }
 0x247   :  { %v1361_v21 = vpack.c.bf16 %v956_v17, %v953_v16 }
 0x248   :  { %v1356_v24 = vpack.c.bf16 %v948_v20, %v945_v19 }
 0x249   :  { %1409 = vst [vmem:[#allocation9 + $0x38] sm:$0xff] %v1361_v21  }
 0x24a   :  { %1408 = vst [vmem:[#allocation9 + $0x30] sm:$0xff] %v1356_v24  }
 0x252   :  { %v1588_v25 = vpop.f32.mrb[32].mxu1 }
 0x253   :  { %v960_v26 = vpop.f32.mrb[33].mxu1  ;;  %v969_v28 = vadd.f32 %v1588_v25, %v1919_v50 }
 0x254   :  { %v1589_v27 = vpop.f32.mrb[34].mxu1  ;;  %v961_v31 = vadd.f32 %v1919_v50, %v960_v26 }
 0x255   :  { %v972_v29 = vadd.f32 %v1589_v27, %v1919_v50  ;;  %v963_v30 = vpop.f32.mrb[35].mxu1 }
 0x256   :  { %v964_v32 = vadd.f32 %v1919_v50, %v963_v30 }
 0x257   :  { %v1371_v33 = vpack.c.bf16 %v972_v29, %v969_v28 }
 0x258   :  { %v1366_v34 = vpack.c.bf16 %v964_v32, %v961_v31 }
 0x259   :  { %1411 = vst [vmem:[#allocation9 + $0x48] sm:$0xff] %v1371_v33  }
 0x25a   :  { %1410 = vst [vmem:[#allocation9 + $0x40] sm:$0xff] %v1366_v34  }
 0x262   :  { %v1592_v35 = vpop.f32.mrb[36].mxu1 }
 0x263   :  { %v976_v36 = vpop.f32.mrb[37].mxu1  ;;  %v985_v38 = vadd.f32 %v1592_v35, %v1919_v50 }
 0x264   :  { %v1593_v37 = vpop.f32.mrb[38].mxu1  ;;  %v977_v41 = vadd.f32 %v1919_v50, %v976_v36 }
 0x265   :  { %v988_v39 = vadd.f32 %v1593_v37, %v1919_v50  ;;  %v979_v40 = vpop.f32.mrb[39].mxu1 }
 0x266   :  { %v980_v42 = vadd.f32 %v1919_v50, %v979_v40 }
 0x267   :  { %v1381_v43 = vpack.c.bf16 %v988_v39, %v985_v38 }
 0x268   :  { %v1376_v44 = vpack.c.bf16 %v980_v42, %v977_v41 }
 0x269   :  { %1413 = vst [vmem:[#allocation9 + $0x58] sm:$0xff] %v1381_v43  }
 0x26a   :  { %1412 = vst [vmem:[#allocation9 + $0x50] sm:$0xff] %v1376_v44   ;;  %v1596_v46 = vpop.f32.mrb[40].mxu1 }
 0x26b   :  { %v992_v47 = vpop.f32.mrb[41].mxu1  ;;  %v1001_v49 = vadd.f32 %v1596_v46, %v1919_v50 }
 0x26c   :  { %v1597_v48 = vpop.f32.mrb[42].mxu1  ;;  %v993_v52 = vadd.f32 %v1919_v50, %v992_v47 }
 0x26d   :  { %v1004_v51 = vadd.f32 %v1597_v48, %v1919_v50  ;;  %v995_v58 = vpop.f32.mrb[43].mxu1 }
 0x26e   :  { %v996_v53 = vadd.f32 %v1919_v50, %v995_v58 }
 0x26f   :  { %v1391_v54 = vpack.c.bf16 %v1004_v51, %v1001_v49 }
 0x270   :  { %v1386_v23 = vpack.c.bf16 %v996_v53, %v993_v52 }
 0x271   :  { %1415 = vst [vmem:[#allocation9 + $0x68] sm:$0xff] %v1391_v54  }
 0x272   :  { %1414 = vst [vmem:[#allocation9 + $0x60] sm:$0xff] %v1386_v23   ;;  %v1600_v45 = vpop.f32.mrb[44].mxu1 }
 0x273   :  { %v1008_v4 = vpop.f32.mrb[45].mxu1  ;;  %v1017_v22 = vadd.f32 %v1600_v45, %v1919_v50 }
 0x274   :  { %v1601_v55 = vpop.f32.mrb[46].mxu1  ;;  %v1009_v59 = vadd.f32 %v1919_v50, %v1008_v4 }
 0x275   :  { %v1020_v56 = vadd.f32 %v1601_v55, %v1919_v50  ;;  %v1011_v57 = vpop.f32.mrb[47].mxu1 }
 0x276   :  { %v1012_v60 = vadd.f32 %v1919_v50, %v1011_v57 }
 0x277   :  { %v1401_v61 = vpack.c.bf16 %v1020_v56, %v1017_v22 }
 0x278   :  { %v1396_v62 = vpack.c.bf16 %v1012_v60, %v1009_v59 }
 0x279   :  { %1417 = vst [vmem:[#allocation9 + $0x78] sm:$0xff] %v1401_v61  }
 0x27a   :  { %1416 = vst [vmem:[#allocation9 + $0x70] sm:$0xff] %v1396_v62  }
 0x27b   :  { %1775 = shalt.err (!%p1772_p0)
}
 0x27c   :  { %s1776_s10 = scalar_lea.hbm %s1972_s4, 2048 }
 0x27d   :  { %p1777_p1 = scmp.ne.s32.totalorder %s1972_s4, %s1776_s10  ;;  %p1780_p2 = scmp.lt.u32.totalorder %s1776_s10, %s1972_s4 }
 0x27f   :  { %p1782_p3 = pnand %p1780_p2, %p1777_p1 }
 0x281   :  { %1785 = shalt.err (!%p1782_p3)
}
 0x282   :  { %1194 = dma.vmem_to_hbm [thread:$0]  %s1189_s6, 2048, %s1972_s4, [#allocation5], %s1793_s25, %s1793_s25, %s1794_s26  }
 0x283   :  { %1790 = dma.done.wait [#allocation5], 2048  }
 0x284   :  { %1791 = vsyncadd [#allocation5], 4294965248 }
 0x285   :  { %1198 = vsyncpa [#allocation4], 1 }
 0x286   :  { %1199 = vsyncpa [#allocation7], 1 }
 0x287   :  { %1200 = vsyncpa [#allocation5], 1 }

</bundles_post_ra>
